<compile_context>
chip_gen: v5e
topology: v5e:2x2
jax: 0.10.0
libtpu: 0.0.40
codegen_flags: <defaults>
</compile_context>

<pallas_src>
import functools

import jax
import jax.numpy as jnp
from jax.experimental import pallas as pl
from jax.experimental.pallas import tpu as pltpu


def _round_up(x: int, m: int) -> int:
    return ((x + m - 1) // m) * m


def _patch_embed_kernel(a_ref, w_ref, b_ref, o_ref):
    # a_ref: (tile_m, K) compute-dtype patches   (pipelined over M)
    # w_ref: (K, E)      compute-dtype weights   (resident: block index constant)
    # b_ref: (1, E)      f32 bias                (resident)
    # o_ref: (tile_m, E) output tile
    acc = jnp.dot(a_ref[...], w_ref[...], preferred_element_type=jnp.float32)
    o_ref[...] = (acc + b_ref[...]).astype(o_ref.dtype)


@functools.partial(
    jax.jit, static_argnames=("patch_size", "compute_dtype", "out_dtype"))
def patch_embedding_block(x, weight, bias, *, patch_size,
                          compute_dtype=jnp.bfloat16, out_dtype=None):
    """x: (B, C, H, W) NCHW; weight: (E, C, p, p) Conv2d weight; bias: (E,).

    Returns (B, num_patches, E) == PyTorch proj(x).flatten(2).transpose(1, 2).

    compute_dtype: MXU input precision (bf16 default; pass jnp.float32 for
      bit-closer-to-PyTorch results at lower throughput).  Accumulation and
      bias add are always f32.
    out_dtype: output dtype; defaults to x.dtype.  Pass jnp.bfloat16 if the
      downstream consumer accepts it (halves the dominant HBM store stream).
    """
    B, C, H, W = x.shape
    E = weight.shape[0]
    p = patch_size
    gh, gw = H // p, W // p
    num_patches = gh * gw
    if out_dtype is None:
        out_dtype = x.dtype

    # Conv2d(stride=p) semantics: trailing pixels not covered by a full patch
    # are dropped.  Slice explicitly (no-op when H, W are divisible by p).
    if (H % p) or (W % p):
        x = x[:, :, : gh * p, : gw * p]

    # --- patch extraction ----------------------------------------------------
    # Cast first so XLA fuses it into the transpose copy: exactly one
    # materialized intermediate, already in compute_dtype.
    # Flatten in (C, ph, pw) order to match Conv2d weight layout (E, C, kh, kw).
    xp = x.astype(compute_dtype).reshape(B, C, gh, p, gw, p)
    xp = jnp.transpose(xp, (0, 2, 4, 1, 3, 5))            # (B, gh, gw, C, p, p)
    patches = xp.reshape(B * num_patches, C * p * p)      # (M, K)
    M, K = patches.shape

    # Weight (E, K) -> (K, E), cast to compute dtype (small, one copy per call).
    w2d = weight.reshape(E, K).T.astype(compute_dtype)    # (K, E)
    b2d = bias.astype(jnp.float32).reshape(1, E)          # (1, E), f32

    # --- M tiling --------------------------------------------------------------
    # tile_m is either the full M (always a legal block) or a multiple of 16
    # (bf16 packs two rows per sublane).  Keep >= 2 tiles when M > 512 so the
    # "parallel" grid axis can land work on both TensorCores (v7x).
    if M <= 512:
        tile_m = M
    elif M <= 2048:
        tile_m = _round_up(pl.cdiv(M, 2), 16)
    else:
        tile_m = 1024
    grid_m = pl.cdiv(M, tile_m)

    c_isz = jnp.dtype(compute_dtype).itemsize
    o_isz = jnp.dtype(out_dtype).itemsize

    # VMEM need: double-buffered A tile + output tile, (possibly double-buffered)
    # resident weights, bias.  Limit = 2x need with a 32 MiB floor, 48 MiB cap
    # (safe on all of v5e/v6e 128 MiB and v7x 64 MiB).
    vmem_need = (2 * tile_m * K * c_isz
                 + 2 * tile_m * E * o_isz
                 + 2 * K * E * c_isz
                 + 2 * E * 4)
    vmem_limit = int(min(48 * 1024 * 1024, max(32 * 1024 * 1024, 2 * vmem_need)))

    cost = pl.CostEstimate(
        flops=2 * M * K * E,
        transcendentals=0,
        bytes_accessed=int(M * K * c_isz + K * E * c_isz + E * 4 + M * E * o_isz),
    )

    out = pl.pallas_call(
        _patch_embed_kernel,
        out_shape=jax.ShapeDtypeStruct((M, E), out_dtype),
        grid=(grid_m,),
        in_specs=[
            pl.BlockSpec((tile_m, K), lambda i: (i, 0)),   # pipelined patches
            pl.BlockSpec((K, E), lambda i: (0, 0)),        # resident weights
            pl.BlockSpec((1, E), lambda i: (0, 0)),        # resident bias
        ],
        out_specs=pl.BlockSpec((tile_m, E), lambda i: (i, 0)),
        compiler_params=pltpu.CompilerParams(
            dimension_semantics=("parallel",),             # shard M tiles across TCs
            vmem_limit_bytes=vmem_limit,
        ),
        cost_estimate=cost,
    )(patches, w2d, b2d)

    # Reshape is free (contiguous); no slicing needed since nothing was padded.
    return out.reshape(B, num_patches, E)


if __name__ == "__main__":
    # Small, module-consistent shapes: img_size=16, patch_size=4,
    # in_chans=4, embed_dim=32, batch=2  ->  num_patches = (16/4)^2 = 16.
    B, C, H, W = 2, 4, 16, 16
    patch_size = 4
    embed_dim = 32

    key = jax.random.PRNGKey(0)
    kx, kw, kb = jax.random.split(key, 3)

    x = jax.random.normal(kx, (B, C, H, W), dtype=jnp.float32)
    # deterministic synthetic parameters (Conv2d weight/bias shapes)
    weight = 0.02 * jax.random.normal(
        kw, (embed_dim, C, patch_size, patch_size), dtype=jnp.float32
    )
    bias = 0.01 * jax.random.normal(kb, (embed_dim,), dtype=jnp.float32)

    out = patch_embedding_block(x, weight, bias, patch_size=patch_size)
    jax.block_until_ready(out)

    num_patches = (H // patch_size) * (W // patch_size)
    assert out.shape == (B, num_patches, embed_dim), out.shape

    # Pure-JAX reference (f32); bf16 MXU inputs -> loose tolerance.
    xp = x.reshape(B, C, H // patch_size, patch_size, W // patch_size, patch_size)
    xp = jnp.transpose(xp, (0, 2, 4, 1, 3, 5)).reshape(B * num_patches, -1)
    ref = (xp @ weight.reshape(embed_dim, -1).T + bias).reshape(
        B, num_patches, embed_dim
    )
    max_err = float(jnp.max(jnp.abs(out - ref)))
    assert max_err < 5e-2, f"max abs error too large: {max_err}"

    print("KERNEL_OK")
</pallas_src>

<mosaic_0001>
module attributes {stable_mosaic.version = 11 : i64} {
  func.func @_patch_embed_kernel(%arg0: i32, %arg1: memref<32x64xbf16, #tpu.memory_space<vmem>>, %arg2: memref<64x32xbf16, #tpu.memory_space<vmem>>, %arg3: memref<1x32xf32, #tpu.memory_space<vmem>>, %arg4: memref<32x32xf32, #tpu.memory_space<vmem>>) attributes {dimension_semantics = [#tpu.dimension_semantics<parallel>], iteration_bounds = array<i64: 1>, scalar_prefetch = 0 : i64, scratch_operands = 0 : i64, tpu.core_type = #tpu.core_type<tc>, window_params = [{transform_indices = @transform_0, window_bounds = array<i64: 32, 64>}, {pipeline_mode = #tpu.pipeline_mode<synchronous>, transform_indices = @transform_1, window_bounds = array<i64: 64, 32>}, {pipeline_mode = #tpu.pipeline_mode<synchronous>, transform_indices = @transform_2, window_bounds = array<i64: 1, 32>}, {transform_indices = @transform_3, window_bounds = array<i64: 32, 32>}]} {
    %c0 = arith.constant 0 : index
    %c0_0 = arith.constant 0 : index
    %0 = vector.load %arg1[%c0, %c0_0] : memref<32x64xbf16, #tpu.memory_space<vmem>>, vector<32x64xbf16>
    %c0_1 = arith.constant 0 : index
    %c0_2 = arith.constant 0 : index
    %1 = vector.load %arg2[%c0_1, %c0_2] : memref<64x32xbf16, #tpu.memory_space<vmem>>, vector<64x32xbf16>
    %cst = arith.constant dense<0.000000e+00> : vector<32x32xf32>
    %2 = tpu.matmul %0, %1, %cst {dimension_numbers = #tpu.dot_dimension_numbers<[1], [0], [0], [1], [0, 0, 1, 1], [], []>} : vector<32x64xbf16>, vector<64x32xbf16>, vector<32x32xf32> -> vector<32x32xf32>
    %c0_3 = arith.constant 0 : index
    %c0_4 = arith.constant 0 : index
    %3 = vector.load %arg3[%c0_3, %c0_4] : memref<1x32xf32, #tpu.memory_space<vmem>>, vector<1x32xf32>
    %4 = vector.broadcast %3 : vector<1x32xf32> to vector<32x32xf32>
    %5 = arith.addf %2, %4 : vector<32x32xf32>
    %c0_5 = arith.constant 0 : index
    %c0_6 = arith.constant 0 : index
    %6 = vector.load %arg4[%c0_5, %c0_6] : memref<32x32xf32, #tpu.memory_space<vmem>>, vector<32x32xf32>
    tpu.vector_store %arg4[%c0_5, %c0_6], %5 {strides = array<i32>} : memref<32x32xf32, #tpu.memory_space<vmem>>, vector<32x32xf32>,
    return
  }
  func.func @transform_0(%arg0: i32) -> (i32, i32) {
    %c0_i32 = arith.constant 0 : i32
    %c0_i32_0 = arith.constant 0 : i32
    return %arg0, %c0_i32 : i32, i32
  }
  func.func @transform_1(%arg0: i32) -> (i32, i32) {
    %c0_i32 = arith.constant 0 : i32
    %c0_i32_0 = arith.constant 0 : i32
    %c0_i32_1 = arith.constant 0 : i32
    return %c0_i32, %c0_i32_0 : i32, i32
  }
  func.func @transform_2(%arg0: i32) -> (i32, i32) {
    %c0_i32 = arith.constant 0 : i32
    %c0_i32_0 = arith.constant 0 : i32
    %c0_i32_1 = arith.constant 0 : i32
    return %c0_i32, %c0_i32_0 : i32, i32
  }
  func.func @transform_3(%arg0: i32) -> (i32, i32) {
    %c0_i32 = arith.constant 0 : i32
    %c0_i32_0 = arith.constant 0 : i32
    return %arg0, %c0_i32 : i32, i32
  }
}

</mosaic_0001>

<bundles_post_ra>
// kernel: patch_embedding_block.1
= control target key start
LH: loop header
LB: loop body
LE: loop exit
PB: predicated region body
PF: predicated region fallthrough
CT: control target
= control target key end

     0   :  { %s232_s0 = inlined_call_operand.vmem [shape: bf16[32,64], index: 0, kind: input, shape index: {}]   ;;  %s233_s1 = inlined_call_operand.vmem [shape: bf16[64,32], index: 1, kind: input, shape index: {}]   ;;  %s234_s2 = inlined_call_operand.vmem [shape: f32[1,32], index: 2, kind: input, shape index: {}]   ;;  %s235_s3 = inlined_call_operand.hbm [shape: f32[32,32], index: 3, kind: output, shape index: {}]  }
   0x1   :  { %v146_v0 = vld [vmem:[%s233_s1 + $0x18] sm:$0xff]  ;;  %v145_v1 = vld [vmem:[%s233_s1 + $0x10] sm:$0xff] }
   0x2   :  { %77 = vmatpush.bf16.msra.mxu0 %v146_v0  ;;  %147 = vmatpush.bf16.msra.mxu1 %v146_v0 }
   0x3   :  { %8 = vsyncpa [#allocation3], 0  ;;  %v144_v2 = vld [vmem:[%s233_s1 + $0x8] sm:$0xff]  ;;  %v143_v3 = vld [vmem:[%s233_s1] sm:$0xff]  ;;  %vm66_vm0 = vcmask 523264   ;;  %vm92_vm1 = vcmask 261120  }
   0x4   :  { %v141_v4 = vld [vmem:[%s232_s0] sm:$0xff]  ;;  %v142_v5 = vld [vmem:[%s232_s0 + $0x8] sm:$0xff]  ;;  %s181_s1 = smov [#allocation2]   ;;  %s103_s28 = sshll.u32 %s235_s3, 4  ;;  %s104_s28 = int_to_ptr.hbm [resolvable:$true] %s103_s28 }
   0x5   :  { %v154_v6 = vld [vmem:[%s234_s2] ss:$0 sm:$0xff]  ;;  %s101_s0 = sshll.u32 %s181_s1, 4  ;;  %s182_s2 = smov 128   ;;  %s102_s0 = int_to_ptr.vmem [resolvable:$true] %s101_s0 }
   0x6   :  { %78 = vmatpush.bf16.msra.mxu0 %v145_v1  ;;  %148 = vmatpush.bf16.msra.mxu1 %v145_v1  ;;  %s183_s29 = smov 8  }
   0xa   :  { %79 = vmatpush.bf16.msra.mxu0 %v144_v2  ;;  %149 = vmatpush.bf16.msra.mxu1 %v144_v2 }
   0xe   :  { %80 = vmatpush.bf16.msra.mxu0 %v143_v3  ;;  %150 = vmatpush.bf16.msra.mxu1 %v143_v3 }
  0x11   :  { %139 = vmatmul.msk.bf16.vlgmr.msra.gmra.mxu0 %vm66_vm0, %v141_v4  ;;  %140 = vmatmul.msk.bf16.vlgmr.msra.gmra.mxu1 %vm66_vm0, %v142_v5 }
  0x8e   :  { %v82_v7 = vpop.f32.mrf.mxu0  ;;  %v87_v8 = vpop.f32.mrf.mxu1 }
  0x8f   :  { %v83_v9 = vadd.f32 %v154_v6, %v82_v7  ;;  %v88_v10 = vadd.f32 %v154_v6, %v87_v8 }
  0x91   :  { %93 = vst.msk [vmem:[#allocation2] sm:$0xff] %vm92_vm1, %v83_v9 }
  0x92   :  { %95 = vst.msk [vmem:[#allocation2 + $0x10] sm:$0xff] %vm92_vm1, %v88_v10 }
  0x96   :  { %v84_v11 = vpop.f32.mrf.mxu0  ;;  %v89_v12 = vpop.f32.mrf.mxu1 }
  0x97   :  { %v85_v13 = vadd.f32 %v154_v6, %v84_v11  ;;  %v90_v14 = vadd.f32 %v154_v6, %v89_v12 }
  0x99   :  { %94 = vst.msk [vmem:[#allocation2 + $0x8] sm:$0xff] %vm92_vm1, %v85_v13 }
  0x9a   :  { %96 = vst.msk [vmem:[#allocation2 + $0x18] sm:$0xff] %vm92_vm1, %v90_v14 }
  0x9b   :  { %109 = dma.vmem_to_hbm [thread:$0]  %s102_s0, 512, %s104_s28, [#allocation3], %s182_s2, %s182_s2, %s183_s29  }
  0x9c   :  { %179 = dma.done.wait [#allocation3], 512  }
  0x9d   :  { %180 = vsyncadd [#allocation3], 4294966784 }
  0x9e   :  { %114 = vsyncpa [#allocation3], 1 }

</bundles_post_ra>
